<compile_context>
chip_gen: v5e
topology: v5e:2x2
jax: 0.10.0
libtpu: 0.0.40
codegen_flags: <defaults>
</compile_context>

<pallas_src>
import jax
import jax.numpy as jnp
from jax.experimental import pallas as pl
from jax.experimental.pallas import tpu as pltpu


def _down_retain_kernel(x_ref, w_ref, b_ref, a_ref, o_ref):
    # x_ref : (4, 1, C, TS)  -- four 2x2-pool phases, channel-major, spatial lanes
    # w_ref : (C, C)         -- conv weight, PyTorch layout w[c_out, c_in]
    # b_ref : (C, 1)         -- conv bias (per output channel / sublane)
    # a_ref : (1,) in SMEM   -- PReLU slope (single shared parameter)
    # o_ref : (1, C, TS)

    # MaxPool2d(2): elementwise max over the four phases (pure VPU work).
    p01 = jnp.maximum(x_ref[0, 0, :, :], x_ref[1, 0, :, :])
    p23 = jnp.maximum(x_ref[2, 0, :, :], x_ref[3, 0, :, :])
    pooled = jnp.maximum(p01, p23)                                  # (C, TS)

    # 1x1 conv == matmul over channels (MXU), plus bias.
    y = jnp.dot(w_ref[...], pooled,
                preferred_element_type=jnp.float32) + b_ref[...]    # (C, TS)

    # PReLU with a single shared slope (scalar read from SMEM).
    alpha = a_ref[0]
    o_ref[0, :, :] = jnp.where(y >= 0, y, alpha * y)


def _pick_spatial_tile(S, C):
    """Lane-dense spatial tile under a ~2 MiB budget for the (4, C, TS) f32 block."""
    if S <= 128:
        return S                                   # full extent is always legal
    budget_bytes = 2 * 1024 * 1024
    ts = (budget_bytes // (4 * 4 * C)) // 128 * 128  # 4 phases * 4 B * C per lane col
    ts = max(128, min(ts, 2048, (S // 128) * 128))
    return ts


def down_retain(x, conv_weight, conv_bias, prelu_alpha):
    """x: (N, C, H, W) f32, conv_weight: (C, C, 1, 1), conv_bias: (C,), prelu_alpha: scalar."""
    N, C, H, W = x.shape
    assert H % 2 == 0 and W % 2 == 0
    Hp, Wp = H // 2, W // 2
    S = Hp * Wp

    # ---- layout plumbing (no arithmetic) ----
    # phases[p*2+q, n, c, hp*Wp+wp] = x[n, c, 2*hp+p, 2*wp+q]
    phases = (x.astype(jnp.float32)
                .reshape(N, C, Hp, 2, Wp, 2)
                .transpose(3, 5, 0, 1, 2, 4)       # (2, 2, N, C, Hp, Wp)
                .reshape(4, N, C, S))

    w = conv_weight.reshape(C, C).astype(jnp.float32)     # w[c_out, c_in]
    b = conv_bias.reshape(C, 1).astype(jnp.float32)
    a = jnp.asarray(prelu_alpha, jnp.float32).reshape(1)

    ts = _pick_spatial_tile(S, C)
    grid = (N, pl.cdiv(S, ts))

    # Explicit scoped-VMEM budget: double-buffered x-block + out-block + params,
    # with headroom; clamped so it stays safe on v7x (64 MiB physical VMEM).
    xblk = 4 * C * ts * 4
    oblk = C * ts * 4
    vmem_limit = int(min(max(4 * (xblk + oblk) + C * C * 4 + (2 << 20), 8 << 20),
                         48 << 20))

    out_flat = pl.pallas_call(
        _down_retain_kernel,
        out_shape=jax.ShapeDtypeStruct((N, C, S), jnp.float32),
        grid=grid,
        in_specs=[
            pl.BlockSpec((4, 1, C, ts), lambda n, i: (0, n, 0, i)),
            pl.BlockSpec((C, C), lambda n, i: (0, 0)),
            pl.BlockSpec((C, 1), lambda n, i: (0, 0)),
            pl.BlockSpec(memory_space=pltpu.MemorySpace.SMEM),
        ],
        out_specs=pl.BlockSpec((1, C, ts), lambda n, i: (n, 0, i)),
        compiler_params=pltpu.CompilerParams(
            dimension_semantics=("parallel", "parallel"),
            vmem_limit_bytes=vmem_limit),
    )(phases, w, b, a)

    # (N, C, S) -> (N, C, Hp, Wp): pure reshape, output is already NCHW.
    return out_flat.reshape(N, C, Hp, Wp)


def _reference(x, conv_weight, conv_bias, prelu_alpha):
    """Pure-JAX reference matching the PyTorch module semantics."""
    N, C, H, W = x.shape
    Hp, Wp = H // 2, W // 2
    pooled = x.reshape(N, C, Hp, 2, Wp, 2).max(axis=(3, 5))          # MaxPool2d(2)
    w = conv_weight.reshape(C, C)
    y = jnp.einsum('oc,nchw->nohw', w, pooled) + conv_bias.reshape(1, C, 1, 1)
    return jnp.where(y >= 0, y, prelu_alpha * y)                      # PReLU


if __name__ == "__main__":
    N, C, H, W = 2, 4, 16, 16

    key = jax.random.PRNGKey(0)
    kx, kw, kb = jax.random.split(key, 3)

    x = jax.random.normal(kx, (N, C, H, W), dtype=jnp.float32)

    # Deterministic, synthetic parameter init (shapes follow nn.Conv2d(C, C, 1)
    # and nn.PReLU() with its default single parameter = 0.25).
    conv_weight = (jax.random.normal(kw, (C, C, 1, 1), dtype=jnp.float32)
                   / jnp.sqrt(jnp.float32(C)))
    conv_bias = 0.1 * jax.random.normal(kb, (C,), dtype=jnp.float32)
    prelu_alpha = jnp.float32(0.25)

    out = jax.jit(down_retain)(x, conv_weight, conv_bias, prelu_alpha)
    out = jax.block_until_ready(out)

    ref = _reference(x, conv_weight, conv_bias, prelu_alpha)
    assert out.shape == (N, C, H // 2, W // 2)
    assert jnp.max(jnp.abs(out - ref)) < 1e-5

    print("KERNEL_OK")
</pallas_src>

<mosaic_0001>
module attributes {stable_mosaic.version = 11 : i64} {
  func.func @_down_retain_kernel(%arg0: i32, %arg1: i32, %arg2: memref<4x1x4x64xf32, #tpu.memory_space<vmem>>, %arg3: memref<4x4xf32, #tpu.memory_space<vmem>>, %arg4: memref<4x1xf32, #tpu.memory_space<vmem>>, %arg5: memref<1xf32, #tpu.memory_space<smem>>, %arg6: memref<1x4x64xf32, #tpu.memory_space<vmem>>) attributes {dimension_semantics = [#tpu.dimension_semantics<parallel>, #tpu.dimension_semantics<parallel>], iteration_bounds = array<i64: 2, 1>, scalar_prefetch = 0 : i64, scratch_operands = 0 : i64, tpu.core_type = #tpu.core_type<tc>, window_params = [{transform_indices = @transform_0, window_bounds = array<i64: 4, 1, 4, 64>}, {pipeline_mode = #tpu.pipeline_mode<synchronous>, transform_indices = @transform_1, window_bounds = array<i64: 4, 4>}, {pipeline_mode = #tpu.pipeline_mode<synchronous>, transform_indices = @transform_2, window_bounds = array<i64: 4, 1>}, {transform_indices = @transform_3, window_bounds = array<i64: 1>}, {transform_indices = @transform_4, window_bounds = array<i64: 1, 4, 64>}]} {
    %c0 = arith.constant 0 : index
    %c0_0 = arith.constant 0 : index
    %c0_1 = arith.constant 0 : index
    %c0_2 = arith.constant 0 : index
    %0 = vector.load %arg2[%c0, %c0_0, %c0_1, %c0_2] : memref<4x1x4x64xf32, #tpu.memory_space<vmem>>, vector<1x1x4x64xf32>
    %1 = vector.shape_cast %0 : vector<1x1x4x64xf32> to vector<4x64xf32>
    %c1 = arith.constant 1 : index
    %c0_3 = arith.constant 0 : index
    %c0_4 = arith.constant 0 : index
    %c0_5 = arith.constant 0 : index
    %2 = vector.load %arg2[%c1, %c0_3, %c0_4, %c0_5] : memref<4x1x4x64xf32, #tpu.memory_space<vmem>>, vector<1x1x4x64xf32>
    %3 = vector.shape_cast %2 : vector<1x1x4x64xf32> to vector<4x64xf32>
    %4 = arith.maximumf %1, %3 : vector<4x64xf32>
    %c2 = arith.constant 2 : index
    %c0_6 = arith.constant 0 : index
    %c0_7 = arith.constant 0 : index
    %c0_8 = arith.constant 0 : index
    %5 = vector.load %arg2[%c2, %c0_6, %c0_7, %c0_8] : memref<4x1x4x64xf32, #tpu.memory_space<vmem>>, vector<1x1x4x64xf32>
    %6 = vector.shape_cast %5 : vector<1x1x4x64xf32> to vector<4x64xf32>
    %c3 = arith.constant 3 : index
    %c0_9 = arith.constant 0 : index
    %c0_10 = arith.constant 0 : index
    %c0_11 = arith.constant 0 : index
    %7 = vector.load %arg2[%c3, %c0_9, %c0_10, %c0_11] : memref<4x1x4x64xf32, #tpu.memory_space<vmem>>, vector<1x1x4x64xf32>
    %8 = vector.shape_cast %7 : vector<1x1x4x64xf32> to vector<4x64xf32>
    %9 = arith.maximumf %6, %8 : vector<4x64xf32>
    %10 = arith.maximumf %4, %9 : vector<4x64xf32>
    %c0_12 = arith.constant 0 : index
    %c0_13 = arith.constant 0 : index
    %11 = vector.load %arg3[%c0_12, %c0_13] : memref<4x4xf32, #tpu.memory_space<vmem>>, vector<4x4xf32>
    %cst = arith.constant dense<0.000000e+00> : vector<4x64xf32>
    %12 = tpu.matmul %11, %10, %cst {dimension_numbers = #tpu.dot_dimension_numbers<[1], [0], [0], [1], [0, 0, 1, 1], [], []>} : vector<4x4xf32>, vector<4x64xf32>, vector<4x64xf32> -> vector<4x64xf32>
    %c0_14 = arith.constant 0 : index
    %c0_15 = arith.constant 0 : index
    %13 = vector.load %arg4[%c0_14, %c0_15] : memref<4x1xf32, #tpu.memory_space<vmem>>, vector<4x1xf32>
    %14 = vector.broadcast %13 : vector<4x1xf32> to vector<4x64xf32>
    %15 = arith.addf %12, %14 : vector<4x64xf32>
    %c0_16 = arith.constant 0 : index
    %16 = memref.load %arg5[%c0_16] : memref<1xf32, #tpu.memory_space<smem>>
    %cst_17 = arith.constant 0.000000e+00 : f32
    %17 = vector.broadcast %cst_17 : f32 to vector<4x64xf32>
    %18 = arith.cmpf oge, %15, %17 : vector<4x64xf32>
    %19 = vector.broadcast %16 : f32 to vector<4x64xf32>
    %20 = arith.mulf %19, %15 : vector<4x64xf32>
    %21 = arith.select %18, %15, %20 : vector<4x64xi1>, vector<4x64xf32>
    %c0_18 = arith.constant 0 : index
    %c0_19 = arith.constant 0 : index
    %c0_20 = arith.constant 0 : index
    %22 = vector.load %arg6[%c0_18, %c0_19, %c0_20] : memref<1x4x64xf32, #tpu.memory_space<vmem>>, vector<1x4x64xf32>
    %23 = vector.shape_cast %22 : vector<1x4x64xf32> to vector<4x64xf32>
    %24 = vector.shape_cast %21 : vector<4x64xf32> to vector<1x4x64xf32>
    tpu.vector_store %arg6[%c0_18, %c0_19, %c0_20], %24 {strides = array<i32>} : memref<1x4x64xf32, #tpu.memory_space<vmem>>, vector<1x4x64xf32>,
    return
  }
  func.func @transform_0(%arg0: i32, %arg1: i32) -> (i32, i32, i32, i32) {
    %c0_i32 = arith.constant 0 : i32
    %c0_i32_0 = arith.constant 0 : i32
    %c0_i32_1 = arith.constant 0 : i32
    return %c0_i32, %arg0, %c0_i32_0, %arg1 : i32, i32, i32, i32
  }
  func.func @transform_1(%arg0: i32, %arg1: i32) -> (i32, i32) {
    %c0_i32 = arith.constant 0 : i32
    %c0_i32_0 = arith.constant 0 : i32
    %c0_i32_1 = arith.constant 0 : i32
    return %c0_i32, %c0_i32_0 : i32, i32
  }
  func.func @transform_2(%arg0: i32, %arg1: i32) -> (i32, i32) {
    %c0_i32 = arith.constant 0 : i32
    %c0_i32_0 = arith.constant 0 : i32
    %c0_i32_1 = arith.constant 0 : i32
    return %c0_i32, %c0_i32_0 : i32, i32
  }
  func.func @transform_3(%arg0: i32, %arg1: i32) -> i32 {
    %c0_i32 = arith.constant 0 : i32
    %c0_i32_0 = arith.constant 0 : i32
    return %c0_i32 : i32
  }
  func.func @transform_4(%arg0: i32, %arg1: i32) -> (i32, i32, i32) {
    %c0_i32 = arith.constant 0 : i32
    %c0_i32_0 = arith.constant 0 : i32
    return %arg0, %c0_i32, %arg1 : i32, i32, i32
  }
}

</mosaic_0001>

<bundles_post_ra>
// kernel: down_retain.1
= control target key start
LH: loop header
LB: loop body
LE: loop exit
PB: predicated region body
PF: predicated region fallthrough
CT: control target
= control target key end

     0   :  { %s604_s0 = inlined_call_operand.vmem [shape: f32[4,2,4,64], index: 0, kind: input, shape index: {}]   ;;  %s605_s1 = inlined_call_operand.vmem [shape: f32[4,4], index: 1, kind: input, shape index: {}]   ;;  %s606_s2 = inlined_call_operand.vmem [shape: f32[4,1], index: 2, kind: input, shape index: {}]   ;;  %s607_s3 = inlined_call_operand.<no memory space> [shape: f32[1], index: 3, kind: input, shape index: {}]   ;;  %s608_s4 = inlined_call_operand.vmem [shape: f32[2,4,64], index: 4, kind: output, shape index: {}]  }
   0x1   :  { %9 = sst [smem:[#allocation2]] %s607_s3 }
   0x2   :  { %s532_s17 = smov 0   ;;  %s534_s18 = smov 0  }
   0x3   :  { %s536_s19 = smov 0   ;;  %s538_s20 = smov 0  }
   0x4   :  { %s540_s21 = smov 0  }
   0x5 LB: > { %s27_s3 = sadd.s32 1, %s497_s20  ;;  %p43_p1 = scmp.ne.s32.totalorder %s489_s18, %s485_s17  ;;  %s501_s21 = sphi %s540_s21, %s15_s21   ;;  %s497_s20 = sphi %s538_s20, %s612_s20   ;;  %s493_s19 = sphi %s536_s19, %s611_s19   ;;  %s489_s18 = sphi %s534_s18, %s610_s18   ;;  %s485_s17 = sphi %s532_s17, %s609_s17  }
   0x6   : > { %p29_p0 = scmp.ge.s32.totalorder %s27_s3, 2  ;;  %p44_p2 = scmp.eq.s32.totalorder %s501_s21, 0 }
   0x7   : > { %s36_s23 = sadd.s32 1, %s489_s18  ;;  %p408_p5 = scmp.ge.s32.totalorder %s501_s21, 2 }
   0x8   : > { %s614_s3 = smov (%p29_p0, %s27_s3), 0  ;;  %p45_p3 = por %p44_p2, %p43_p1 }
   0x9   : > { %s31_s22 = ssub.s32 %s497_s20, %s614_s3  ;;  %169 = sbr.rel (%p408_p5) target bundleno = 22 (0x16), region = 28 }
   0xa   : > { %p34_p4 = scmp.eq.s32.totalorder %s31_s22, 0 }
   0xc   : > { %s567_s24 = scalar_select %p34_p4, %s489_s18, %s36_s23  }
   0xe   : > { %172 = sbr.rel (!%p45_p3) target bundleno = 22 (0x16), region = 32  ;;  %s174_s25 = sand.u32 (%p45_p3), 1, %s489_s18  }
   0xf   : > { %s410_s26 = sshll.u32 (%p45_p3), %s497_s20, 2  ;;  %s409_s27 = sshll.u32 (%p45_p3), %s174_s25, 4 }
  0x10   : > { %s179_s30 = scalar_lea.vmem (%p45_p3), %s604_s0, %s410_s26  ;;  %s176_s5 = scalar_lea.vmem (%p45_p3), [#allocation3], %s409_s27 }
  0x11   : > { %v196_v0 = vld [vmem:[%s179_s30] sm:$0xf] (%p45_p3)  ;;  %v198_v1 = vld [vmem:[%s179_s30 + $0x8] sm:$0xf] (%p45_p3)  ;;  %v200_v2 = vld [vmem:[%s179_s30 + $0x10] sm:$0xf] (%p45_p3) }
  0x12   : > { %197 = vst [vmem:[%s176_s5] sm:$0xf] (%p45_p3), %v196_v0  ;;  %v202_v3 = vld [vmem:[%s179_s30 + $0x18] sm:$0xf] (%p45_p3) }
  0x13   : > { %199 = vst [vmem:[%s176_s5 + $0x4] sm:$0xf] %v198_v1 }
  0x14   : > { %201 = vst [vmem:[%s176_s5 + $0x8] sm:$0xf] %v200_v2 }
  0x15   : > { %203 = vst [vmem:[%s176_s5 + $0xc] sm:$0xf] %v202_v3 }
  0x16 PF: > { %p411_p6 = scmp.ge.s32.totalorder %s501_s21, 1  ;;  %p234_p7 = scmp.lt.s32.totalorder %s501_s21, 3 }
  0x18   : > { %p235_p8 = pnand %p411_p6, %p234_p7 }
  0x19   : > { %s241_s6 = sand.u32 (!%p235_p8), 1, %s485_s17   ;;  %p268_p9 = scmp.lt.s32.totalorder (!%p235_p8), %s493_s19, 1 }
  0x1a   : > { %238 = sbr.rel (%p235_p8) target bundleno = 170 (0xaa), region = 73  ;;  %s412_s7 = sshll.u32 (!%p235_p8), %s241_s6, 4 }
  0x1b   : > { %s243_s10 = scalar_lea.vmem (!%p235_p8), [#allocation3], %s412_s7  ;;  %s320_s13 = sld [smem:[#allocation2]] (!%p235_p8) }
  0x1f   : > { %v503_v4 = vmov 0   ;;  %v286_v5 = vld [vmem:[%s606_s2] sm:$0xf]  ;;  %v414_v7 = vld [vmem:[%s243_s10 + $0x4] sm:$0xf]  ;;  %vm296_vm0 = vcmask 1043456  }
  0x20   : > { %462 = vset.pattern.permute.xlu0 %v503_v4  ;;  %v275_v6 = vld [vmem:[%s243_s10] sm:$0xf]  ;;  %v415_v8 = vld [vmem:[%s243_s10 + $0x8] sm:$0xf]  ;;  %v416_v10 = vld [vmem:[%s243_s10 + $0xc] sm:$0xf] }
  0x21   : > { %289 = vperm.xlu0 %462, %v286_v5   ;;  %v278_v9 = vmax.f32 %v275_v6, %v414_v7  ;;  %v283_v11 = vmax.f32 %v415_v8, %v416_v10  ;;  %v285_v13 = vld [vmem:[%s605_s1] sm:$0xf]  ;;  %vm292_vm1 = vcmask 31744   ;;  %s616_s19 = smov (!%p268_p9, %s493_s19), 1  ;;  %v322_v16 = vstv %s320_s13 }
  0x22   : > { %s413_s14 = sshll.u32 %s616_s19, 2  ;;  %vm325_vm3 = vcmask 519168  }
  0x23   : > { %v284_v12 = vmax.f32 %v278_v9, %v283_v11  ;;  %s274_s17 = scalar_lea.vmem %s608_s4, %s413_s14 }
  0x25   : > { %417 = vmatpush.msk.msra.mxu0 %vm296_vm0, %v284_v12 }
  0x26   : > { %418 = vmatmul.msk.f32.vlgmr.msra.gmra.mxu0 %vm292_vm1, %v285_v13 }
  0x93   : > { %v290_v14 = vpop.permute.xlu0 %289 }
  0xa3   : > { %v317_v15 = vpop.f32.mrf.mxu0 }
  0xa4   : > { %v318_v17 = vadd.f32 %v317_v15, %v290_v14 }
  0xa6   : > { %vm321_vm2 = vcmp.ge.f32.partialorder %v318_v17, 0.0  ;;  %v323_v18 = vmul.f32 %v322_v16, %v318_v17 }
  0xa8   : > { %v324_v19 = vsel %vm321_vm2, %v318_v17, %v323_v18 }
  0xa9   : > { %326 = vst.msk [vmem:[%s274_s17] sm:$0xf] %vm325_vm3, %v324_v19 }
  0xaa PF: > { %s15_s21 = sadd.s32 1, %s501_s21   ;;  %s609_s17 = smov %s489_s18 }
  0xab   : > { %p12_p10 = scmp.ge.s32.totalorder %s15_s21, 4   ;;  %s610_s18 = smov %s567_s24 }
  0xac   : > { %s611_s19 = smov %s497_s20  ;;  %s612_s20 = smov %s614_s3 }
  0xad   :  { %14 = sbr.rel (!%p12_p10) target bundleno = 5 (0x5), region = 115 }

</bundles_post_ra>
